<compile_context>
chip_gen: v5e
topology: v5e:2x2
jax: 0.10.0
libtpu: 0.0.40
codegen_flags: <defaults>
</compile_context>

<pallas_src>
import functools

import jax
import jax.numpy as jnp
from jax.experimental import pallas as pl
from jax.experimental.pallas import tpu as pltpu

_LANES = 128
_EPS = 1e-12          # torch.nn.functional.normalize default eps
_EPS2 = _EPS * _EPS   # compare against squared norms (== max(||x||, eps) form)


def _round_up(x, m):
    return ((x + m - 1) // m) * m


def _device_defaults():
    """Per-generation block-size / sharding defaults (HBM-roofline sizing)."""
    kind = ""
    try:
        kind = jax.devices()[0].device_kind.lower()
    except Exception:
        pass
    if "v5 lite" in kind or "v5e" in kind or "v5lite" in kind:
        return {"block_bytes": 3 << 19, "num_shards": 1}       # ~1.5 MiB, 1 TC
    if "v6" in kind or "trillium" in kind:
        return {"block_bytes": 3 << 20, "num_shards": 1}       # ~3 MiB, 1 TC
    if "7" in kind:                                            # v7x: 2 TCs, 64 MiB VMEM
        return {"block_bytes": 5 << 20, "num_shards": 2}
    return {"block_bytes": 2 << 20, "num_shards": 1}


def _pick_batch_tile(n, max_bt):
    """Largest batch tile <= max_bt; prefer a divisor of n (no masking) unless that
    would lose more than 2x batching."""
    max_bt = max(1, min(n, max_bt))
    div = 1
    for b in range(max_bt, 0, -1):
        if n % b == 0:
            div = b
            break
    return div if div * 2 > max_bt else max_bt


def _vmem_limit_bytes(in_block_bytes, temp_bytes, out_block_bytes):
    need = 4 * in_block_bytes + temp_bytes + 2 * out_block_bytes + (4 << 20)
    return int(min(60 << 20, max(32 << 20, need)))


def _channel_sums(p_ref, t_ref, c):
    """(dot, pp, tt) summed over the channel axis (axis 1 of the refs).

    For small C the loop is unrolled per channel slab so temporaries stay at
    ~block/C instead of materializing full-block products."""
    if c <= 16:
        dot = pp = tt = None
        for ci in range(c):
            pc = p_ref[:, ci].astype(jnp.float32)
            tc = t_ref[:, ci].astype(jnp.float32)
            d, p2, t2 = pc * tc, pc * pc, tc * tc
            if dot is None:
                dot, pp, tt = d, p2, t2
            else:
                dot, pp, tt = dot + d, pp + p2, tt + t2
        return dot, pp, tt
    p = p_ref[...].astype(jnp.float32)
    t = t_ref[...].astype(jnp.float32)
    return (jnp.sum(p * t, axis=1), jnp.sum(p * p, axis=1), jnp.sum(t * t, axis=1))


def _cos_kernel_aligned(p_ref, t_ref, o_ref, *, c, bt, tile_s, shard_blocks,
                        s_total, n_total, mask_rows, mask_batch, reduce_to_8):
    """One step over a (bt, C, tile_s, 128) slab (H*W % 128 == 0 path)."""
    j = pl.program_id(2)

    @pl.when(j == 0)
    def _():
        o_ref[...] = jnp.zeros_like(o_ref)

    dot, pp, tt = _channel_sums(p_ref, t_ref, c)          # (bt, tile_s, 128)

    # 1/max(||x||, eps) == rsqrt(max(||x||^2, eps^2))  -> EUP, own VLIW slot.
    inv_p = jax.lax.rsqrt(jnp.maximum(pp, _EPS2))
    inv_t = jax.lax.rsqrt(jnp.maximum(tt, _EPS2))
    cos = dot * inv_p * inv_t                              # (bt, tile_s, 128)

    if mask_rows or mask_batch:
        valid = None
        if mask_rows:
            s_block = pl.program_id(1) * shard_blocks + j  # intended (unclamped)
            row = s_block * tile_s + jax.lax.broadcasted_iota(jnp.int32, cos.shape, 1)
            valid = row < s_total
        if mask_batch:
            b = pl.program_id(0) * bt + jax.lax.broadcasted_iota(jnp.int32, cos.shape, 0)
            vb = b < n_total
            valid = vb if valid is None else jnp.logical_and(valid, vb)
        cos = jnp.where(valid, cos, 0.0)

    if reduce_to_8:
        # Tile-aligned regrouping of (bt, tile_s, 128) sublane rows -> (8, 128) partial.
        red = jnp.sum(cos.reshape(bt * (tile_s // 8), 8, _LANES), axis=0)
    else:
        red = jnp.sum(cos, axis=0)                         # (tile_s, 128), small tile_s
    o_ref[...] += red[None, None]


def _cos_kernel_unaligned(p_ref, t_ref, o_ref, *, c, bt, tile_cols, shard_blocks,
                          hw, n_total, mask_cols, mask_batch):
    """One step over a (bt, C, tile_cols) slab (H*W not a multiple of 128)."""
    j = pl.program_id(2)

    @pl.when(j == 0)
    def _():
        o_ref[...] = jnp.zeros_like(o_ref)

    dot, pp, tt = _channel_sums(p_ref, t_ref, c)           # (bt, tile_cols)

    inv_p = jax.lax.rsqrt(jnp.maximum(pp, _EPS2))
    inv_t = jax.lax.rsqrt(jnp.maximum(tt, _EPS2))
    cos = dot * inv_p * inv_t                               # (bt, tile_cols)

    if mask_cols or mask_batch:
        valid = None
        if mask_cols:
            c_block = pl.program_id(1) * shard_blocks + j
            col = c_block * tile_cols + jax.lax.broadcasted_iota(jnp.int32, cos.shape, 1)
            valid = col < hw
        if mask_batch:
            b = pl.program_id(0) * bt + jax.lax.broadcasted_iota(jnp.int32, cos.shape, 0)
            vb = b < n_total
            valid = vb if valid is None else jnp.logical_and(valid, vb)
        cos = jnp.where(valid, cos, 0.0)

    o_ref[...] += cos[None, None]


def _loss_aligned(preds, truths, n, c, hw, block_bytes, num_shards):
    s_total = hw // _LANES
    itemsize = preds.dtype.itemsize

    # Free views of contiguous NCHW (no transpose, no copy).
    p4 = preds.reshape(n, c, s_total, _LANES)
    t4 = truths.reshape(n, c, s_total, _LANES)

    slab_bytes = c * s_total * _LANES * itemsize           # one whole image
    row_bytes = c * _LANES * itemsize                      # one 128-pixel row
    if slab_bytes >= block_bytes:
        bt = 1
        tile_s = max(8, min(s_total, (block_bytes // row_bytes) // 8 * 8))
    else:
        tile_s = s_total                                   # full dim (any size)
        bt = _pick_batch_tile(n, block_bytes // max(slab_bytes, 1))

    n_sblocks = pl.cdiv(s_total, tile_s)
    nb = pl.cdiv(n, bt)

    p_shards = 1
    if num_shards > 1 and nb == 1 and n_sblocks > 1:       # feed both v7x TCs
        p_shards = min(num_shards, n_sblocks)
    shard_blocks = pl.cdiv(n_sblocks, p_shards)

    mask_rows = (p_shards * shard_blocks * tile_s) != s_total
    mask_batch = (nb * bt) != n
    reduce_to_8 = (tile_s % 8 == 0)
    out_r = 8 if reduce_to_8 else tile_s

    def in_map(b, p, j):
        s_block = p * shard_blocks + j
        # Clamp shard-overshoot steps to a valid block; their contribution is masked.
        return (b, 0, jnp.minimum(s_block, n_sblocks - 1), 0)

    def out_map(b, p, j):
        return (b, p, 0, 0)

    kernel = functools.partial(
        _cos_kernel_aligned, c=c, bt=bt, tile_s=tile_s, shard_blocks=shard_blocks,
        s_total=s_total, n_total=n, mask_rows=mask_rows, mask_batch=mask_batch,
        reduce_to_8=reduce_to_8)

    in_block_vmem = bt * c * _round_up(tile_s, 8) * _LANES * itemsize
    temp_vmem = 8 * _round_up(in_block_vmem // max(c, 1), 4096)
    out_block_vmem = out_r * _LANES * 4

    partials = pl.pallas_call(
        kernel,
        out_shape=jax.ShapeDtypeStruct((nb, p_shards, out_r, _LANES), jnp.float32),
        grid_spec=pltpu.PrefetchScalarGridSpec(
            num_scalar_prefetch=0,
            grid=(nb, p_shards, shard_blocks),
            in_specs=[
                pl.BlockSpec((bt, c, tile_s, _LANES), in_map),
                pl.BlockSpec((bt, c, tile_s, _LANES), in_map),
            ],
            out_specs=pl.BlockSpec((1, 1, out_r, _LANES), out_map),
        ),
        compiler_params=pltpu.CompilerParams(
            dimension_semantics=("parallel", "parallel", "arbitrary"),
            vmem_limit_bytes=_vmem_limit_bytes(in_block_vmem, temp_vmem, out_block_vmem),
        ),
    )(p4, t4)

    return -jnp.sum(partials) / jnp.float32(n * hw)


def _loss_unaligned(preds, truths, n, c, hw, block_bytes, num_shards):
    itemsize = preds.dtype.itemsize

    p3 = preds.reshape(n, c, hw)                           # free view, NO pad copy
    t3 = truths.reshape(n, c, hw)

    image_bytes = c * hw * itemsize
    if hw < _LANES or image_bytes <= block_bytes:
        tile_cols = hw                                     # full dim (any size)
        bt = _pick_batch_tile(n, block_bytes // max(image_bytes, 1))
    else:
        bt = 1
        tile_cols = (block_bytes // (c * itemsize)) // _LANES * _LANES
        tile_cols = max(_LANES, min(tile_cols, (hw // _LANES) * _LANES))

    n_cblocks = pl.cdiv(hw, tile_cols)
    nb = pl.cdiv(n, bt)

    p_shards = 1
    if num_shards > 1 and nb == 1 and n_cblocks > 1:
        p_shards = min(num_shards, n_cblocks)
    shard_blocks = pl.cdiv(n_cblocks, p_shards)

    mask_cols = (p_shards * shard_blocks * tile_cols) != hw
    mask_batch = (nb * bt) != n

    def in_map(b, p, j):
        return (b, 0, jnp.minimum(p * shard_blocks + j, n_cblocks - 1))

    def out_map(b, p, j):
        return (b, p, 0, 0)

    kernel = functools.partial(
        _cos_kernel_unaligned, c=c, bt=bt, tile_cols=tile_cols,
        shard_blocks=shard_blocks, hw=hw, n_total=n,
        mask_cols=mask_cols, mask_batch=mask_batch)

    in_block_vmem = bt * _round_up(c, 8) * _round_up(tile_cols, _LANES) * itemsize
    temp_vmem = 8 * _round_up(bt * _round_up(tile_cols, _LANES) * 4, 4096)
    out_block_vmem = bt * _round_up(tile_cols, _LANES) * 4

    partials = pl.pallas_call(
        kernel,
        out_shape=jax.ShapeDtypeStruct((nb, p_shards, bt, tile_cols), jnp.float32),
        grid_spec=pltpu.PrefetchScalarGridSpec(
            num_scalar_prefetch=0,
            grid=(nb, p_shards, shard_blocks),
            in_specs=[
                pl.BlockSpec((bt, c, tile_cols), in_map),
                pl.BlockSpec((bt, c, tile_cols), in_map),
            ],
            out_specs=pl.BlockSpec((1, 1, bt, tile_cols), out_map),
        ),
        compiler_params=pltpu.CompilerParams(
            dimension_semantics=("parallel", "parallel", "arbitrary"),
            vmem_limit_bytes=_vmem_limit_bytes(in_block_vmem, temp_vmem, out_block_vmem),
        ),
    )(p3, t3)

    return -jnp.sum(partials) / jnp.float32(n * hw)


def cosine_angular_loss(preds, truths, *, block_bytes=None, num_shards=None):
    """preds, truths: NCHW arrays (f32 or bf16). Returns scalar f32 loss."""
    assert preds.shape == truths.shape
    n, c, h, w = preds.shape
    hw = h * w

    defaults = _device_defaults()
    if block_bytes is None:
        block_bytes = defaults["block_bytes"]
    if num_shards is None:
        num_shards = defaults["num_shards"]

    if hw % _LANES == 0:
        return _loss_aligned(preds, truths, n, c, hw, block_bytes, num_shards)
    return _loss_unaligned(preds, truths, n, c, hw, block_bytes, num_shards)


def _reference_loss(preds, truths):
    """Pure-JAX reference mirroring the PyTorch module."""
    def normalize(x):
        x = x.astype(jnp.float32)
        nrm = jnp.sqrt(jnp.sum(x * x, axis=1, keepdims=True))
        return x / jnp.maximum(nrm, _EPS)

    pn = normalize(preds)
    tn = normalize(truths)
    return jnp.mean(-jnp.sum(pn * tn, axis=1))


if __name__ == "__main__":
    key = jax.random.PRNGKey(0)
    keys = jax.random.split(key, 12)

    def check(preds, truths, tol=1e-5, **kw):
        got = jax.block_until_ready(cosine_angular_loss(preds, truths, **kw))
        want = jax.block_until_ready(_reference_loss(preds, truths))
        assert jnp.allclose(got, want, atol=tol, rtol=tol), (got, want, kw)

    # 1) Aligned H*W (16*16 = 2*128), C=4 -- single-block fast path, default sizing.
    p = jax.random.normal(keys[0], (2, 4, 16, 16), jnp.float32)
    t = jax.random.normal(keys[1], (2, 4, 16, 16), jnp.float32)
    check(p, t)

    # 2) Unaligned H*W < 128 -- full-dim lane block, no pad copy.
    p = jax.random.normal(keys[2], (1, 3, 10, 12), jnp.float32)
    t = jax.random.normal(keys[3], (1, 3, 10, 12), jnp.float32)
    check(p, t)

    # 3) Unaligned H*W = 1600, small forced blocks + 2 pixel shards
    #    (exercises shard clamp, boundary-lane masking, reduction-axis accumulation).
    p = jax.random.normal(keys[4], (1, 4, 40, 40), jnp.float32)
    t = jax.random.normal(keys[5], (1, 4, 40, 40), jnp.float32)
    check(p, t, block_bytes=4096, num_shards=2)

    # 4) Aligned small images batched 2-per-block with a ragged batch (N=3)
    #    (exercises batch-tile masking of the partial last batch block).
    p = jax.random.normal(keys[6], (3, 4, 16, 16), jnp.float32)
    t = jax.random.normal(keys[7], (3, 4, 16, 16), jnp.float32)
    check(p, t, block_bytes=8192, num_shards=1)

    # 5) Aligned multi-step reduction axis with row masking and the (8,128)
    #    in-kernel partial reduction (tile_s = 8, s_total = 20).
    p = jax.random.normal(keys[8], (1, 2, 32, 80), jnp.float32)
    t = jax.random.normal(keys[9], (1, 2, 32, 80), jnp.float32)
    check(p, t, block_bytes=4096, num_shards=1)

    # 6) bf16 inputs (halves HBM traffic; kernel upcasts to f32 internally).
    p = jax.random.normal(keys[10], (2, 4, 16, 16), jnp.bfloat16)
    t = jax.random.normal(keys[11], (2, 4, 16, 16), jnp.bfloat16)
    check(p, t, tol=1e-4)

    print("KERNEL_OK")
</pallas_src>

<mosaic_0001>
module attributes {stable_mosaic.version = 11 : i64} {
  func.func @_cos_kernel_aligned(%arg0: i32, %arg1: i32, %arg2: i32, %arg3: memref<2x4x2x128xf32, #tpu.memory_space<vmem>>, %arg4: memref<2x4x2x128xf32, #tpu.memory_space<vmem>>, %arg5: memref<1x1x2x128xf32, #tpu.memory_space<vmem>>) attributes {dimension_semantics = [#tpu.dimension_semantics<parallel>, #tpu.dimension_semantics<parallel>, #tpu.dimension_semantics<arbitrary>], iteration_bounds = array<i64: 1, 1, 1>, scalar_prefetch = 0 : i64, scratch_operands = 0 : i64, tpu.core_type = #tpu.core_type<tc>, window_params = [{transform_indices = @transform_0, window_bounds = array<i64: 2, 4, 2, 128>}, {transform_indices = @transform_1, window_bounds = array<i64: 2, 4, 2, 128>}, {transform_indices = @transform_2, window_bounds = array<i64: 1, 1, 2, 128>}]} {
    %c0_i32 = arith.constant 0 : i32
    %0 = arith.cmpi eq, %arg2, %c0_i32 : i32
    %1 = arith.extui %0 : i1 to i32
    %c0_i32_0 = arith.constant 0 : i32
    %2 = arith.cmpi ne, %1, %c0_i32_0 : i32
    scf.if %2 {
      %cst_39 = arith.constant 0.000000e+00 : f32
      %53 = vector.broadcast %cst_39 : f32 to vector<1x1x2x128xf32>
      %c0_40 = arith.constant 0 : index
      %c0_41 = arith.constant 0 : index
      %c0_42 = arith.constant 0 : index
      %c0_43 = arith.constant 0 : index
      %54 = vector.load %arg5[%c0_40, %c0_41, %c0_42, %c0_43] : memref<1x1x2x128xf32, #tpu.memory_space<vmem>>, vector<1x1x2x128xf32>
      tpu.vector_store %arg5[%c0_40, %c0_41, %c0_42, %c0_43], %53 {strides = array<i32>} : memref<1x1x2x128xf32, #tpu.memory_space<vmem>>, vector<1x1x2x128xf32>,
    } else {
    }
    %c0 = arith.constant 0 : index
    %c0_1 = arith.constant 0 : index
    %c0_2 = arith.constant 0 : index
    %c0_3 = arith.constant 0 : index
    %3 = vector.load %arg3[%c0, %c0_1, %c0_2, %c0_3] : memref<2x4x2x128xf32, #tpu.memory_space<vmem>>, vector<2x1x2x128xf32>
    %4 = vector.shape_cast %3 : vector<2x1x2x128xf32> to vector<2x2x128xf32>
    %c0_4 = arith.constant 0 : index
    %c0_5 = arith.constant 0 : index
    %c0_6 = arith.constant 0 : index
    %c0_7 = arith.constant 0 : index
    %5 = vector.load %arg4[%c0_4, %c0_5, %c0_6, %c0_7] : memref<2x4x2x128xf32, #tpu.memory_space<vmem>>, vector<2x1x2x128xf32>
    %6 = vector.shape_cast %5 : vector<2x1x2x128xf32> to vector<2x2x128xf32>
    %7 = arith.mulf %4, %6 : vector<2x2x128xf32>
    %8 = arith.mulf %4, %4 : vector<2x2x128xf32>
    %9 = arith.mulf %6, %6 : vector<2x2x128xf32>
    %c0_8 = arith.constant 0 : index
    %c1 = arith.constant 1 : index
    %c0_9 = arith.constant 0 : index
    %c0_10 = arith.constant 0 : index
    %10 = vector.load %arg3[%c0_8, %c1, %c0_9, %c0_10] : memref<2x4x2x128xf32, #tpu.memory_space<vmem>>, vector<2x1x2x128xf32>
    %11 = vector.shape_cast %10 : vector<2x1x2x128xf32> to vector<2x2x128xf32>
    %c0_11 = arith.constant 0 : index
    %c1_12 = arith.constant 1 : index
    %c0_13 = arith.constant 0 : index
    %c0_14 = arith.constant 0 : index
    %12 = vector.load %arg4[%c0_11, %c1_12, %c0_13, %c0_14] : memref<2x4x2x128xf32, #tpu.memory_space<vmem>>, vector<2x1x2x128xf32>
    %13 = vector.shape_cast %12 : vector<2x1x2x128xf32> to vector<2x2x128xf32>
    %14 = arith.mulf %11, %13 : vector<2x2x128xf32>
    %15 = arith.mulf %11, %11 : vector<2x2x128xf32>
    %16 = arith.mulf %13, %13 : vector<2x2x128xf32>
    %17 = arith.addf %7, %14 : vector<2x2x128xf32>
    %18 = arith.addf %8, %15 : vector<2x2x128xf32>
    %19 = arith.addf %9, %16 : vector<2x2x128xf32>
    %c0_15 = arith.constant 0 : index
    %c2 = arith.constant 2 : index
    %c0_16 = arith.constant 0 : index
    %c0_17 = arith.constant 0 : index
    %20 = vector.load %arg3[%c0_15, %c2, %c0_16, %c0_17] : memref<2x4x2x128xf32, #tpu.memory_space<vmem>>, vector<2x1x2x128xf32>
    %21 = vector.shape_cast %20 : vector<2x1x2x128xf32> to vector<2x2x128xf32>
    %c0_18 = arith.constant 0 : index
    %c2_19 = arith.constant 2 : index
    %c0_20 = arith.constant 0 : index
    %c0_21 = arith.constant 0 : index
    %22 = vector.load %arg4[%c0_18, %c2_19, %c0_20, %c0_21] : memref<2x4x2x128xf32, #tpu.memory_space<vmem>>, vector<2x1x2x128xf32>
    %23 = vector.shape_cast %22 : vector<2x1x2x128xf32> to vector<2x2x128xf32>
    %24 = arith.mulf %21, %23 : vector<2x2x128xf32>
    %25 = arith.mulf %21, %21 : vector<2x2x128xf32>
    %26 = arith.mulf %23, %23 : vector<2x2x128xf32>
    %27 = arith.addf %17, %24 : vector<2x2x128xf32>
    %28 = arith.addf %18, %25 : vector<2x2x128xf32>
    %29 = arith.addf %19, %26 : vector<2x2x128xf32>
    %c0_22 = arith.constant 0 : index
    %c3 = arith.constant 3 : index
    %c0_23 = arith.constant 0 : index
    %c0_24 = arith.constant 0 : index
    %30 = vector.load %arg3[%c0_22, %c3, %c0_23, %c0_24] : memref<2x4x2x128xf32, #tpu.memory_space<vmem>>, vector<2x1x2x128xf32>
    %31 = vector.shape_cast %30 : vector<2x1x2x128xf32> to vector<2x2x128xf32>
    %c0_25 = arith.constant 0 : index
    %c3_26 = arith.constant 3 : index
    %c0_27 = arith.constant 0 : index
    %c0_28 = arith.constant 0 : index
    %32 = vector.load %arg4[%c0_25, %c3_26, %c0_27, %c0_28] : memref<2x4x2x128xf32, #tpu.memory_space<vmem>>, vector<2x1x2x128xf32>
    %33 = vector.shape_cast %32 : vector<2x1x2x128xf32> to vector<2x2x128xf32>
    %34 = arith.mulf %31, %33 : vector<2x2x128xf32>
    %35 = arith.mulf %31, %31 : vector<2x2x128xf32>
    %36 = arith.mulf %33, %33 : vector<2x2x128xf32>
    %37 = arith.addf %27, %34 : vector<2x2x128xf32>
    %38 = arith.addf %28, %35 : vector<2x2x128xf32>
    %39 = arith.addf %29, %36 : vector<2x2x128xf32>
    %cst = arith.constant 1.000000e-24 : f32
    %40 = vector.broadcast %cst : f32 to vector<2x2x128xf32>
    %41 = arith.maximumf %38, %40 : vector<2x2x128xf32>
    %42 = math.rsqrt %41 : vector<2x2x128xf32>
    %cst_29 = arith.constant 1.000000e-24 : f32
    %43 = vector.broadcast %cst_29 : f32 to vector<2x2x128xf32>
    %44 = arith.maximumf %39, %43 : vector<2x2x128xf32>
    %45 = math.rsqrt %44 : vector<2x2x128xf32>
    %46 = arith.mulf %37, %42 : vector<2x2x128xf32>
    %47 = arith.mulf %46, %45 : vector<2x2x128xf32>
    %cst_30 = arith.constant dense<0.000000e+00> : vector<2x128xf32>
    %48 = vector.multi_reduction <add>, %47, %cst_30 [0] : vector<2x2x128xf32> to vector<2x128xf32>
    %c0_31 = arith.constant 0 : index
    %c0_32 = arith.constant 0 : index
    %c0_33 = arith.constant 0 : index
    %c0_34 = arith.constant 0 : index
    %49 = vector.load %arg5[%c0_31, %c0_32, %c0_33, %c0_34] : memref<1x1x2x128xf32, #tpu.memory_space<vmem>>, vector<1x1x2x128xf32>
    %50 = vector.shape_cast %48 : vector<2x128xf32> to vector<1x1x2x128xf32>
    %51 = arith.addf %49, %50 : vector<1x1x2x128xf32>
    %c0_35 = arith.constant 0 : index
    %c0_36 = arith.constant 0 : index
    %c0_37 = arith.constant 0 : index
    %c0_38 = arith.constant 0 : index
    %52 = vector.load %arg5[%c0_35, %c0_36, %c0_37, %c0_38] : memref<1x1x2x128xf32, #tpu.memory_space<vmem>>, vector<1x1x2x128xf32>
    tpu.vector_store %arg5[%c0_35, %c0_36, %c0_37, %c0_38], %51 {strides = array<i32>} : memref<1x1x2x128xf32, #tpu.memory_space<vmem>>, vector<1x1x2x128xf32>,
    return
  }
  func.func @transform_0(%arg0: i32, %arg1: i32, %arg2: i32) -> (i32, i32, i32, i32) {
    %c1_i32 = arith.constant 1 : i32
    %0 = arith.muli %arg1, %c1_i32 : i32
    %1 = arith.addi %0, %arg2 : i32
    %c0_i32 = arith.constant 0 : i32
    %2 = arith.minsi %1, %c0_i32 : i32
    %c0_i32_0 = arith.constant 0 : i32
    %c0_i32_1 = arith.constant 0 : i32
    %c0_i32_2 = arith.constant 0 : i32
    return %arg0, %c0_i32_0, %2, %c0_i32_1 : i32, i32, i32, i32
  }
  func.func @transform_1(%arg0: i32, %arg1: i32, %arg2: i32) -> (i32, i32, i32, i32) {
    %c1_i32 = arith.constant 1 : i32
    %0 = arith.muli %arg1, %c1_i32 : i32
    %1 = arith.addi %0, %arg2 : i32
    %c0_i32 = arith.constant 0 : i32
    %2 = arith.minsi %1, %c0_i32 : i32
    %c0_i32_0 = arith.constant 0 : i32
    %c0_i32_1 = arith.constant 0 : i32
    %c0_i32_2 = arith.constant 0 : i32
    return %arg0, %c0_i32_0, %2, %c0_i32_1 : i32, i32, i32, i32
  }
  func.func @transform_2(%arg0: i32, %arg1: i32, %arg2: i32) -> (i32, i32, i32, i32) {
    %c0_i32 = arith.constant 0 : i32
    %c0_i32_0 = arith.constant 0 : i32
    %c0_i32_1 = arith.constant 0 : i32
    return %arg0, %arg1, %c0_i32, %c0_i32_0 : i32, i32, i32, i32
  }
}

</mosaic_0001>

<bundles_post_ra>
// kernel: tpu_custom_call.1
= control target key start
LH: loop header
LB: loop body
LE: loop exit
PB: predicated region body
PF: predicated region fallthrough
CT: control target
= control target key end

     0   :  { %7 = vsyncpa [#allocation3], 0  ;;  %s334_s0 = inlined_call_operand.hbm [shape: f32[2,4,2,128], index: 0, kind: input, shape index: {}]   ;;  %s335_s1 = inlined_call_operand.hbm [shape: f32[2,4,2,128], index: 1, kind: input, shape index: {}]   ;;  %s336_s2 = inlined_call_operand.hbm [shape: f32[1,1,2,128], index: 2, kind: output, shape index: {}]  }
   0x1   :  { %8 = vsyncpa [#allocation6], 0 }
   0x2   :  { %9 = vsyncpa [#allocation4], 0  ;;  %s19_s11 = sshll.u32 %s334_s0, 4  ;;  %s298_s12 = smov [#allocation2]   ;;  %s20_s11 = int_to_ptr.hbm [resolvable:$true] %s19_s11 }
   0x3   :  { %s21_s13 = sshll.u32 %s298_s12, 4  ;;  %s37_s16 = sshll.u32 %s335_s1, 4  ;;  %s22_s13 = int_to_ptr.vmem [resolvable:$true] %s21_s13  ;;  %s38_s16 = int_to_ptr.hbm [resolvable:$true] %s37_s16 }
   0x4   :  { %s299_s17 = smov 32   ;;  %s300_s18 = smov 2  }
   0x5   :  { %27 = dma.hbm_to_vmem [thread:$0]  %s20_s11, 256, %s22_s13, [#allocation3], %s299_s17, %s299_s17, %s300_s18  }
   0x6   :  { %s301_s19 = smov [#allocation5]  }
   0x7   :  { %s39_s20 = sshll.u32 %s301_s19, 4  ;;  %s40_s20 = int_to_ptr.vmem [resolvable:$true] %s39_s20 }
   0x8   :  { %45 = dma.hbm_to_vmem [thread:$0]  %s38_s16, 256, %s40_s20, [#allocation6], %s299_s17, %s299_s17, %s300_s18  }
   0x9   :  { %292 = dma.done.wait [#allocation3], 256  }
   0xa   :  { %293 = vsyncadd [#allocation3], 4294967040 }
   0xb   :  { %294 = dma.done.wait [#allocation6], 256  }
   0xc   :  { %295 = vsyncadd [#allocation6], 4294967040  ;;  %v302_v0 = vmov 0.0   ;;  %v65_v1 = vld [vmem:[#allocation2] sm:$0x3]  ;;  %vm177_vm12 = vcmask 1041408  }
   0xd   :  { %64 = vst [vmem:[#allocation7] sm:$0x3] %v302_v0  ;;  %v66_v2 = vld [vmem:[#allocation2 + $0x8] sm:$0x3]  ;;  %v67_v3 = vld [vmem:[#allocation5] sm:$0x3]  ;;  %v71_v5 = vmul.f32 %v65_v1, %v65_v1 }
   0xe   :  { %v68_v4 = vld [vmem:[#allocation5 + $0x8] sm:$0x3]  ;;  %v72_v6 = vmul.f32 %v66_v2, %v66_v2  ;;  %v73_v7 = vmul.f32 %v67_v3, %v67_v3  ;;  %v76_v8 = vld [vmem:[#allocation2 + $0x2] sm:$0x3]  ;;  %v77_v9 = vld [vmem:[#allocation2 + $0xa] sm:$0x3]  ;;  %v69_v45 = vmul.f32 %v67_v3, %v65_v1 }
   0xf   :  { %v74_v10 = vmul.f32 %v68_v4, %v68_v4  ;;  %v79_v11 = vld [vmem:[#allocation5 + $0x2] sm:$0x3]  ;;  %v80_v12 = vld [vmem:[#allocation5 + $0xa] sm:$0x3]  ;;  %v83_v13 = vmul.f32 %v76_v8, %v76_v8  ;;  %v84_v14 = vmul.f32 %v77_v9, %v77_v9  ;;  %v94_v15 = vld [vmem:[#allocation2 + $0x4] sm:$0x3]  ;;  %v70_v51 = vmul.f32 %v68_v4, %v66_v2 }
  0x10   :  { %v85_v16 = vmul.f32 %v79_v11, %v79_v11  ;;  %v86_v17 = vmul.f32 %v80_v12, %v80_v12  ;;  %v95_v18 = vld [vmem:[#allocation2 + $0xc] sm:$0x3]  ;;  %v97_v19 = vld [vmem:[#allocation5 + $0x4] sm:$0x3]  ;;  %v98_v20 = vld [vmem:[#allocation5 + $0xc] sm:$0x3]  ;;  %v101_v26 = vmul.f32 %v94_v15, %v94_v15  ;;  %v81_v46 = vmul.f32 %v79_v11, %v76_v8 }
  0x11   :  { %v89_v21 = vadd.f32 %v83_v13, %v71_v5  ;;  %v90_v22 = vadd.f32 %v84_v14, %v72_v6  ;;  %v112_v25 = vld [vmem:[#allocation2 + $0x6] sm:$0x3]  ;;  %v102_v27 = vmul.f32 %v95_v18, %v95_v18  ;;  %v103_v28 = vmul.f32 %v97_v19, %v97_v19  ;;  %v113_v30 = vld [vmem:[#allocation2 + $0xe] sm:$0x3]  ;;  %v115_v31 = vld [vmem:[#allocation5 + $0x6] sm:$0x3] }
  0x12   :  { %v91_v23 = vadd.f32 %v85_v16, %v73_v7  ;;  %v92_v24 = vadd.f32 %v86_v17, %v74_v10  ;;  %v104_v29 = vmul.f32 %v98_v20, %v98_v20  ;;  %v116_v32 = vld [vmem:[#allocation5 + $0xe] sm:$0x3]  ;;  %v119_v37 = vmul.f32 %v112_v25, %v112_v25  ;;  %s303_s0 = smov [#allocation7]   ;;  %s191_s23 = sshll.u32 %s336_s2, 4  ;;  %s192_s23 = int_to_ptr.hbm [resolvable:$true] %s191_s23 }
  0x13   :  { %v107_v33 = vadd.f32 %v101_v26, %v89_v21  ;;  %v108_v34 = vadd.f32 %v102_v27, %v90_v22  ;;  %v120_v38 = vmul.f32 %v113_v30, %v113_v30  ;;  %v121_v39 = vmul.f32 %v115_v31, %v115_v31  ;;  %s189_s1 = sshll.u32 %s303_s0, 4  ;;  %s190_s1 = int_to_ptr.vmem [resolvable:$true] %s189_s1 }
  0x14   :  { %v109_v35 = vadd.f32 %v103_v28, %v91_v23  ;;  %v110_v36 = vadd.f32 %v104_v29, %v92_v24  ;;  %v122_v40 = vmul.f32 %v116_v32, %v116_v32  ;;  %v82_v52 = vmul.f32 %v80_v12, %v77_v9 }
  0x15   :  { %v125_v41 = vadd.f32 %v119_v37, %v107_v33  ;;  %v126_v42 = vadd.f32 %v120_v38, %v108_v34  ;;  %v87_v53 = vadd.f32 %v81_v46, %v69_v45  ;;  %v99_v54 = vmul.f32 %v97_v19, %v94_v15  ;;  %v181_v34 = vld [vmem:[#allocation7] sm:$0x3] }
  0x16   :  { %v127_v43 = vadd.f32 %v121_v39, %v109_v35  ;;  %v128_v44 = vadd.f32 %v122_v40, %v110_v36  ;;  %v88_v55 = vadd.f32 %v82_v52, %v70_v51  ;;  %v100_v56 = vmul.f32 %v98_v20, %v95_v18 }
  0x17   :  { %v129_v47 = vmax.f32 %v125_v41, 1e-24  ;;  %v130_v48 = vmax.f32 %v126_v42, 1e-24  ;;  %v105_v58 = vadd.f32 %v99_v54, %v87_v53  ;;  %v117_v59 = vmul.f32 %v115_v31, %v112_v25 }
  0x18   :  { %v151_v49 = vmax.f32 %v127_v43, 1e-24  ;;  %v152_v50 = vmax.f32 %v128_v44, 1e-24  ;;  %v106_v1 = vadd.f32 %v100_v56, %v88_v55  ;;  %v118_v2 = vmul.f32 %v116_v32, %v113_v30 }
  0x19   :  { %212 = vrsqrt.f32 %v129_v47  ;;  %v123_v4 = vadd.f32 %v117_v59, %v105_v58  ;;  %vm137_vm0 = vweird.f32 %v129_v47  ;;  %vm147_vm2 = vweird.f32 %v130_v48 }
  0x1a   :  { %214 = vrsqrt.f32 %v130_v48  ;;  %vm159_vm4 = vweird.f32 %v151_v49  ;;  %vm169_vm7 = vweird.f32 %v152_v50  ;;  %v124_v17 = vadd.f32 %v118_v2, %v106_v1 }
  0x1b   :  { %216 = vrsqrt.f32 %v151_v49 }
  0x1c   :  { %218 = vrsqrt.f32 %v152_v50 }
  0x1f   :  { %v213_v57 = vpop.eup %212 }
  0x20   :  { %v215_v60 = vpop.eup %214  ;;  %v132_v61 = vmul.f32 %v213_v57, %v129_v47  ;;  %vm138_vm1 = vweird.f32 %v213_v57 }
  0x21   :  { %v217_v62 = vpop.eup %216  ;;  %v142_v63 = vmul.f32 %v215_v60, %v130_v48  ;;  %vm148_vm3 = vweird.f32 %v215_v60  ;;  %vm325_vm6 = vmor %vm137_vm0, %vm138_vm1 }
  0x22   :  { %v219_v0 = vpop.eup %218  ;;  %v133_v3 = vmul.f32 %v213_v57, %v132_v61  ;;  %v154_v5 = vmul.f32 %v217_v62, %v151_v49  ;;  %vm160_vm5 = vweird.f32 %v217_v62  ;;  %vm149_vm9 = vmor %vm147_vm2, %vm148_vm3 }
  0x23   :  { %v143_v6 = vmul.f32 %v215_v60, %v142_v63  ;;  %v164_v7 = vmul.f32 %v219_v0, %v152_v50  ;;  %vm170_vm8 = vweird.f32 %v219_v0  ;;  %vm161_vm10 = vmor %vm159_vm4, %vm160_vm5 }
  0x24   :  { %v134_v8 = vmul.f32 0.5, %v133_v3  ;;  %v155_v9 = vmul.f32 %v217_v62, %v154_v5  ;;  %vm171_vm11 = vmor %vm169_vm7, %vm170_vm8 }
  0x25   :  { %v144_v10 = vmul.f32 0.5, %v143_v6  ;;  %v165_v11 = vmul.f32 %v219_v0, %v164_v7 }
  0x26   :  { %v135_v12 = vsub.f32 1.5, %v134_v8  ;;  %v156_v13 = vmul.f32 0.5, %v155_v9 }
  0x27   :  { %v145_v15 = vsub.f32 1.5, %v144_v10  ;;  %v166_v16 = vmul.f32 0.5, %v165_v11 }
  0x28   :  { %v136_v18 = vmul.f32 %v213_v57, %v135_v12  ;;  %v157_v19 = vsub.f32 1.5, %v156_v13 }
  0x29   :  { %v146_v20 = vmul.f32 %v215_v60, %v145_v15  ;;  %v167_v21 = vsub.f32 1.5, %v166_v16 }
  0x2a   :  { %v140_v22 = vsel %vm325_vm6, %v213_v57, %v136_v18  ;;  %v158_v23 = vmul.f32 %v217_v62, %v157_v19 }
  0x2b   :  { %v150_v24 = vsel %vm149_vm9, %v215_v60, %v146_v20  ;;  %v168_v25 = vmul.f32 %v219_v0, %v167_v21  ;;  %v173_v26 = vmul.f32 %v140_v22, %v123_v4 }
  0x2c   :  { %v162_v27 = vsel %vm161_vm10, %v217_v62, %v158_v23  ;;  %v174_v28 = vmul.f32 %v150_v24, %v124_v17 }
  0x2d   :  { %v172_v29 = vsel %vm171_vm11, %v219_v0, %v168_v25  ;;  %v175_v30 = vmul.f32 %v173_v26, %v162_v27 }
  0x2e   :  { %v176_v31 = vmul.f32 %v174_v28, %v172_v29 }
  0x2f   :  { %v178_v32 = vsel %vm177_vm12, %v175_v30, 0.0 }
  0x30   :  { %v179_v33 = vsel %vm177_vm12, %v176_v31, 0.0 }
  0x31   :  { %v180_v35 = vadd.f32 %v179_v33, %v178_v32 }
  0x33   :  { %v182_v36 = vadd.f32 %v181_v34, %v180_v35 }
  0x35   :  { %183 = vst [vmem:[#allocation7] sm:$0x3] %v182_v36 }
  0x36   :  { %194 = dma.vmem_to_hbm [thread:$0]  %s190_s1, 32, %s192_s23, [#allocation4]  }
  0x37   :  { %296 = dma.done.wait [#allocation4], 32  }
  0x38   :  { %297 = vsyncadd [#allocation4], 4294967264 }
  0x39   :  { %199 = vsyncpa [#allocation3], 1 }
  0x3a   :  { %200 = vsyncpa [#allocation6], 1 }
  0x3b   :  { %201 = vsyncpa [#allocation4], 1 }

</bundles_post_ra>
